<compile_context>
chip_gen: v5e
topology: v5e:2x2
jax: 0.10.0
libtpu: 0.0.40
codegen_flags: <defaults>
</compile_context>

<pallas_src>
import jax
import jax.numpy as jnp
from jax.experimental import pallas as pl
from jax.experimental.pallas import tpu as pltpu

HIDDEN_SIZE = 32
INPUT_SIZE = 6      # len(features)
OUTPUT_SIZE = 1


def lstm_fc_kernel(xproj_ref, whh_ref, fcw_ref, fcb_ref, out_ref):
    """LSTM recurrence (input projection precomputed) + final Linear.

    Gate blocks along the 4H lane axis are in permuted order f|i|o|g, with the
    g-gate pre-activation pre-scaled by 2 (so tanh(g) == 2*sigmoid(gates_g)-1).

    xproj_ref : (T, B, 4H) f32   x @ W_ih + b_ih + b_hh, time-major, permuted/scaled
    whh_ref   : (4H, 4H)   f32   permuted/scaled W_hh (rows [H,4H) are zero padding)
    fcw_ref   : (1, 4H)    f32   fc.weight (lanes [H,4H) are zero padding)
    fcb_ref   : (1, 1)     f32   fc.bias (SMEM scalar)
    out_ref   : (B, 4H)    f32   fc output broadcast across lanes (col 0 = answer)
    """
    T, B, G = xproj_ref.shape          # G == 4H == 128 lanes
    H = G // 4

    whh = whh_ref[...]
    fcw = fcw_ref[...]
    fcb = fcb_ref[0, 0]

    # Lane mask selecting the g-gate block, which lives at lanes [3H, 4H).
    lane = jax.lax.broadcasted_iota(jnp.int32, (B, G), 1)
    is_g = lane >= 3 * H

    # State carried as full 128-lane vregs; the true h/c live in lanes [0, H).
    # Lanes [H, 4H) accumulate bounded junk (|junk| <= T); it never reaches the
    # real computation because whh rows [H,4H) and fcw lanes [H,4H) are zero.
    h = jnp.zeros((B, G), jnp.float32)
    c = jnp.zeros((B, G), jnp.float32)

    # T is a trace-time constant -> fully unrolled recurrence (static indexing).
    for t in range(T):
        gates = xproj_ref[t] + jnp.dot(h, whh, preferred_element_type=jnp.float32)
        sig = jax.nn.sigmoid(gates)                    # single whole-vreg EUP op
        act = jnp.where(is_g, 2.0 * sig - 1.0, sig)    # f|i|o|g activated (VPU)
        # o sits at the direction-symmetric 2H offset -> lanes [0,H) after roll.
        o_al = pltpu.roll(act, 2 * H, axis=1)          # blocks: o|g|f|i
        # act * o_al has i*g in BOTH blocks 1 and 3; a roll by H is therefore
        # direction-independent and lands i*g at lanes [0, H).
        ig_al = pltpu.roll(act * o_al, H, axis=1)
        c = act * c + ig_al                            # f*c + i*g
        h = o_al * jnp.tanh(c)                         # o * tanh(c)

    # fc head: VPU multiply + XLU lane reduce (no MXU push/drain for N=1);
    # store a lane-dense full vreg, wrapper slices column 0.
    # NOTE: hardcodes OUTPUT_SIZE == 1 (only lanes [0,H) of fcw are populated).
    score = jnp.sum(h * fcw, axis=-1, keepdims=True) + fcb     # (B, 1)
    out_ref[...] = jnp.broadcast_to(score, (B, G))


def _permute_and_scale_gates(w, g_scale=2.0):
    """Permute last (4H) axis from PyTorch order i|f|g|o to f|i|o|g and scale
    the g block by `g_scale` (folds tanh(x) = 2*sigmoid(2x)-1 into one sigmoid)."""
    H = w.shape[-1] // 4
    i, f, g, o = (w[..., k * H:(k + 1) * H] for k in range(4))
    return jnp.concatenate([f, i, o, g_scale * g], axis=-1)


def lstm_cnn_forward(x, params):
    """x: (B, T, I) float32 (batch-first, like the PyTorch module). Returns (B, 1)."""
    B, T, I = x.shape
    H = params["w_hh"].shape[0]
    G = 4 * H
    # The whole-vreg roll trick requires the gate axis to span exactly one vreg.
    assert G == 128, "kernel assumes 4 * hidden_size == 128 lanes"
    assert params["fc_w"].shape[1] == OUTPUT_SIZE == 1, "fc head hardcodes output_size == 1"

    x = x.astype(jnp.float32)

    # Gate-permuted (f|i|o|g) and g-scaled parameters, done once on tiny arrays.
    wih_p = _permute_and_scale_gates(params["w_ih"])                 # (I, 4H)
    whh_p = _permute_and_scale_gates(params["w_hh"])                 # (H, 4H)
    bias_p = _permute_and_scale_gates(params["b_ih"] + params["b_hh"]).reshape(1, 1, G)

    # Hoisted input projection: one (T*B, I) x (I, 4H) matmul with the bias
    # folded in, produced time-major so the kernel uses leading-axis indexing.
    xproj = jnp.einsum("bti,ig->tbg", x, wih_p,
                       preferred_element_type=jnp.float32) + bias_p  # (T, B, 4H)

    # Zero-pad so the full-128-lane state never leaks junk into real lanes.
    whh_pad = jnp.pad(whh_p, ((0, 3 * H), (0, 0)))                   # (4H, 4H)
    fcw_pad = jnp.pad(params["fc_w"].T, ((0, 0), (0, 3 * H)))        # (1, 4H)
    fcb = params["fc_b"].reshape(1, 1)

    vmem = pl.BlockSpec(memory_space=pltpu.MemorySpace.VMEM)
    smem = pl.BlockSpec(memory_space=pltpu.MemorySpace.SMEM)
    out_wide = pl.pallas_call(
        lstm_fc_kernel,
        out_shape=jax.ShapeDtypeStruct((B, G), jnp.float32),
        in_specs=[vmem, vmem, vmem, smem],
        out_specs=vmem,
    )(xproj, whh_pad, fcw_pad, fcb)

    return out_wide[:, :OUTPUT_SIZE]


def init_params(key, input_size=INPUT_SIZE, hidden_size=HIDDEN_SIZE,
                output_size=OUTPUT_SIZE):
    """Deterministic init mirroring PyTorch's U(-1/sqrt(H), 1/sqrt(H)) for LSTM/Linear."""
    k = 1.0 / jnp.sqrt(jnp.float32(hidden_size))
    keys = jax.random.split(key, 6)
    u = lambda kk, shape: jax.random.uniform(kk, shape, jnp.float32, -k, k)
    return {
        # stored already transposed relative to PyTorch (which is (4H, I) / (4H, H))
        "w_ih": u(keys[0], (input_size, 4 * hidden_size)),
        "w_hh": u(keys[1], (hidden_size, 4 * hidden_size)),
        "b_ih": u(keys[2], (4 * hidden_size,)),
        "b_hh": u(keys[3], (4 * hidden_size,)),
        "fc_w": u(keys[4], (hidden_size, output_size)),
        "fc_b": u(keys[5], (output_size,)),
    }


def reference_forward(x, params):
    """Pure-JAX reference (PyTorch gate order i,f,g,o) for a sanity check."""
    B, T, I = x.shape
    H = params["w_hh"].shape[0]
    bias = params["b_ih"] + params["b_hh"]
    h = jnp.zeros((B, H), jnp.float32)
    c = jnp.zeros((B, H), jnp.float32)
    for t in range(T):
        gates = x[:, t, :] @ params["w_ih"] + h @ params["w_hh"] + bias
        i_g = jax.nn.sigmoid(gates[:, 0 * H:1 * H])
        f_g = jax.nn.sigmoid(gates[:, 1 * H:2 * H])
        g_g = jnp.tanh(gates[:, 2 * H:3 * H])
        o_g = jax.nn.sigmoid(gates[:, 3 * H:4 * H])
        c = f_g * c + i_g * g_g
        h = o_g * jnp.tanh(c)
    return h @ params["fc_w"] + params["fc_b"]


if __name__ == "__main__":
    key = jax.random.PRNGKey(0)
    pkey, xkey = jax.random.split(key)

    batch, seq = 2, 8
    params = init_params(pkey)
    x = jax.random.normal(xkey, (batch, seq, INPUT_SIZE), jnp.float32)

    out = lstm_cnn_forward(x, params)
    out = jax.block_until_ready(out)

    ref = reference_forward(x, params)
    assert out.shape == (batch, OUTPUT_SIZE)
    assert jnp.allclose(out, ref, atol=1e-4, rtol=1e-4), (out, ref)

    print("KERNEL_OK")
</pallas_src>

<mosaic_0001>
module attributes {stable_mosaic.version = 11 : i64} {
  func.func @lstm_fc_kernel(%arg0: memref<8x2x128xf32, #tpu.memory_space<vmem>>, %arg1: memref<128x128xf32, #tpu.memory_space<vmem>>, %arg2: memref<1x128xf32, #tpu.memory_space<vmem>>, %arg3: memref<1x1xf32, #tpu.memory_space<smem>>, %arg4: memref<2x128xf32, #tpu.memory_space<vmem>>) attributes {dimension_semantics = [], scalar_prefetch = 0 : i64, scratch_operands = 0 : i64, tpu.core_type = #tpu.core_type<tc>} {
    %c0 = arith.constant 0 : index
    %c0_0 = arith.constant 0 : index
    %0 = vector.load %arg1[%c0, %c0_0] : memref<128x128xf32, #tpu.memory_space<vmem>>, vector<128x128xf32>
    %c0_1 = arith.constant 0 : index
    %c0_2 = arith.constant 0 : index
    %1 = vector.load %arg2[%c0_1, %c0_2] : memref<1x128xf32, #tpu.memory_space<vmem>>, vector<1x128xf32>
    %c0_3 = arith.constant 0 : index
    %c0_4 = arith.constant 0 : index
    %2 = memref.load %arg3[%c0_3, %c0_4] : memref<1x1xf32, #tpu.memory_space<smem>>
    %3 = tpu.iota {dimensions = array<i32: 1>} : vector<2x128xi32>
    %c96_i32 = arith.constant 96 : i32
    %4 = vector.broadcast %c96_i32 : i32 to vector<2x128xi32>
    %5 = arith.cmpi sge, %3, %4 : vector<2x128xi32>
    %cst = arith.constant 0.000000e+00 : f32
    %6 = vector.broadcast %cst : f32 to vector<2x128xf32>
    %cst_5 = arith.constant 0.000000e+00 : f32
    %7 = vector.broadcast %cst_5 : f32 to vector<2x128xf32>
    %c0_6 = arith.constant 0 : index
    %c0_7 = arith.constant 0 : index
    %c0_8 = arith.constant 0 : index
    %8 = vector.load %arg0[%c0_6, %c0_7, %c0_8] : memref<8x2x128xf32, #tpu.memory_space<vmem>>, vector<1x2x128xf32>
    %9 = vector.shape_cast %8 : vector<1x2x128xf32> to vector<2x128xf32>
    %cst_9 = arith.constant dense<0.000000e+00> : vector<2x128xf32>
    %10 = tpu.matmul %6, %0, %cst_9 {dimension_numbers = #tpu.dot_dimension_numbers<[1], [0], [0], [1], [0, 0, 1, 1], [], []>} : vector<2x128xf32>, vector<128x128xf32>, vector<2x128xf32> -> vector<2x128xf32>
    %11 = arith.addf %9, %10 : vector<2x128xf32>
    %12 = arith.negf %11 : vector<2x128xf32>
    %13 = math.exp %12 : vector<2x128xf32>
    %cst_10 = arith.constant 1.000000e+00 : f32
    %14 = vector.broadcast %cst_10 : f32 to vector<2x128xf32>
    %15 = arith.addf %14, %13 : vector<2x128xf32>
    %16 = arith.divf %14, %15 : vector<2x128xf32>
    %cst_11 = arith.constant 2.000000e+00 : f32
    %17 = vector.broadcast %cst_11 : f32 to vector<2x128xf32>
    %18 = arith.mulf %17, %16 : vector<2x128xf32>
    %cst_12 = arith.constant 1.000000e+00 : f32
    %19 = vector.broadcast %cst_12 : f32 to vector<2x128xf32>
    %20 = arith.subf %18, %19 : vector<2x128xf32>
    %21 = arith.select %5, %20, %16 : vector<2x128xi1>, vector<2x128xf32>
    %c64_i32 = arith.constant 64 : i32
    %22 = tpu.dynamic_rotate %21 by %c64_i32 dim 1 : vector<2x128xf32>, i32 -> vector<2x128xf32>
    %23 = arith.mulf %21, %22 : vector<2x128xf32>
    %c32_i32 = arith.constant 32 : i32
    %24 = tpu.dynamic_rotate %23 by %c32_i32 dim 1 : vector<2x128xf32>, i32 -> vector<2x128xf32>
    %25 = arith.mulf %21, %7 : vector<2x128xf32>
    %26 = arith.addf %25, %24 : vector<2x128xf32>
    %27 = math.tanh %26 : vector<2x128xf32>
    %28 = arith.mulf %22, %27 : vector<2x128xf32>
    %c1 = arith.constant 1 : index
    %c0_13 = arith.constant 0 : index
    %c0_14 = arith.constant 0 : index
    %29 = vector.load %arg0[%c1, %c0_13, %c0_14] : memref<8x2x128xf32, #tpu.memory_space<vmem>>, vector<1x2x128xf32>
    %30 = vector.shape_cast %29 : vector<1x2x128xf32> to vector<2x128xf32>
    %cst_15 = arith.constant dense<0.000000e+00> : vector<2x128xf32>
    %31 = tpu.matmul %28, %0, %cst_15 {dimension_numbers = #tpu.dot_dimension_numbers<[1], [0], [0], [1], [0, 0, 1, 1], [], []>} : vector<2x128xf32>, vector<128x128xf32>, vector<2x128xf32> -> vector<2x128xf32>
    %32 = arith.addf %30, %31 : vector<2x128xf32>
    %33 = arith.negf %32 : vector<2x128xf32>
    %34 = math.exp %33 : vector<2x128xf32>
    %cst_16 = arith.constant 1.000000e+00 : f32
    %35 = vector.broadcast %cst_16 : f32 to vector<2x128xf32>
    %36 = arith.addf %35, %34 : vector<2x128xf32>
    %37 = arith.divf %35, %36 : vector<2x128xf32>
    %cst_17 = arith.constant 2.000000e+00 : f32
    %38 = vector.broadcast %cst_17 : f32 to vector<2x128xf32>
    %39 = arith.mulf %38, %37 : vector<2x128xf32>
    %cst_18 = arith.constant 1.000000e+00 : f32
    %40 = vector.broadcast %cst_18 : f32 to vector<2x128xf32>
    %41 = arith.subf %39, %40 : vector<2x128xf32>
    %42 = arith.select %5, %41, %37 : vector<2x128xi1>, vector<2x128xf32>
    %c64_i32_19 = arith.constant 64 : i32
    %43 = tpu.dynamic_rotate %42 by %c64_i32_19 dim 1 : vector<2x128xf32>, i32 -> vector<2x128xf32>
    %44 = arith.mulf %42, %43 : vector<2x128xf32>
    %c32_i32_20 = arith.constant 32 : i32
    %45 = tpu.dynamic_rotate %44 by %c32_i32_20 dim 1 : vector<2x128xf32>, i32 -> vector<2x128xf32>
    %46 = arith.mulf %42, %26 : vector<2x128xf32>
    %47 = arith.addf %46, %45 : vector<2x128xf32>
    %48 = math.tanh %47 : vector<2x128xf32>
    %49 = arith.mulf %43, %48 : vector<2x128xf32>
    %c2 = arith.constant 2 : index
    %c0_21 = arith.constant 0 : index
    %c0_22 = arith.constant 0 : index
    %50 = vector.load %arg0[%c2, %c0_21, %c0_22] : memref<8x2x128xf32, #tpu.memory_space<vmem>>, vector<1x2x128xf32>
    %51 = vector.shape_cast %50 : vector<1x2x128xf32> to vector<2x128xf32>
    %cst_23 = arith.constant dense<0.000000e+00> : vector<2x128xf32>
    %52 = tpu.matmul %49, %0, %cst_23 {dimension_numbers = #tpu.dot_dimension_numbers<[1], [0], [0], [1], [0, 0, 1, 1], [], []>} : vector<2x128xf32>, vector<128x128xf32>, vector<2x128xf32> -> vector<2x128xf32>
    %53 = arith.addf %51, %52 : vector<2x128xf32>
    %54 = arith.negf %53 : vector<2x128xf32>
    %55 = math.exp %54 : vector<2x128xf32>
    %cst_24 = arith.constant 1.000000e+00 : f32
    %56 = vector.broadcast %cst_24 : f32 to vector<2x128xf32>
    %57 = arith.addf %56, %55 : vector<2x128xf32>
    %58 = arith.divf %56, %57 : vector<2x128xf32>
    %cst_25 = arith.constant 2.000000e+00 : f32
    %59 = vector.broadcast %cst_25 : f32 to vector<2x128xf32>
    %60 = arith.mulf %59, %58 : vector<2x128xf32>
    %cst_26 = arith.constant 1.000000e+00 : f32
    %61 = vector.broadcast %cst_26 : f32 to vector<2x128xf32>
    %62 = arith.subf %60, %61 : vector<2x128xf32>
    %63 = arith.select %5, %62, %58 : vector<2x128xi1>, vector<2x128xf32>
    %c64_i32_27 = arith.constant 64 : i32
    %64 = tpu.dynamic_rotate %63 by %c64_i32_27 dim 1 : vector<2x128xf32>, i32 -> vector<2x128xf32>
    %65 = arith.mulf %63, %64 : vector<2x128xf32>
    %c32_i32_28 = arith.constant 32 : i32
    %66 = tpu.dynamic_rotate %65 by %c32_i32_28 dim 1 : vector<2x128xf32>, i32 -> vector<2x128xf32>
    %67 = arith.mulf %63, %47 : vector<2x128xf32>
    %68 = arith.addf %67, %66 : vector<2x128xf32>
    %69 = math.tanh %68 : vector<2x128xf32>
    %70 = arith.mulf %64, %69 : vector<2x128xf32>
    %c3 = arith.constant 3 : index
    %c0_29 = arith.constant 0 : index
    %c0_30 = arith.constant 0 : index
    %71 = vector.load %arg0[%c3, %c0_29, %c0_30] : memref<8x2x128xf32, #tpu.memory_space<vmem>>, vector<1x2x128xf32>
    %72 = vector.shape_cast %71 : vector<1x2x128xf32> to vector<2x128xf32>
    %cst_31 = arith.constant dense<0.000000e+00> : vector<2x128xf32>
    %73 = tpu.matmul %70, %0, %cst_31 {dimension_numbers = #tpu.dot_dimension_numbers<[1], [0], [0], [1], [0, 0, 1, 1], [], []>} : vector<2x128xf32>, vector<128x128xf32>, vector<2x128xf32> -> vector<2x128xf32>
    %74 = arith.addf %72, %73 : vector<2x128xf32>
    %75 = arith.negf %74 : vector<2x128xf32>
    %76 = math.exp %75 : vector<2x128xf32>
    %cst_32 = arith.constant 1.000000e+00 : f32
    %77 = vector.broadcast %cst_32 : f32 to vector<2x128xf32>
    %78 = arith.addf %77, %76 : vector<2x128xf32>
    %79 = arith.divf %77, %78 : vector<2x128xf32>
    %cst_33 = arith.constant 2.000000e+00 : f32
    %80 = vector.broadcast %cst_33 : f32 to vector<2x128xf32>
    %81 = arith.mulf %80, %79 : vector<2x128xf32>
    %cst_34 = arith.constant 1.000000e+00 : f32
    %82 = vector.broadcast %cst_34 : f32 to vector<2x128xf32>
    %83 = arith.subf %81, %82 : vector<2x128xf32>
    %84 = arith.select %5, %83, %79 : vector<2x128xi1>, vector<2x128xf32>
    %c64_i32_35 = arith.constant 64 : i32
    %85 = tpu.dynamic_rotate %84 by %c64_i32_35 dim 1 : vector<2x128xf32>, i32 -> vector<2x128xf32>
    %86 = arith.mulf %84, %85 : vector<2x128xf32>
    %c32_i32_36 = arith.constant 32 : i32
    %87 = tpu.dynamic_rotate %86 by %c32_i32_36 dim 1 : vector<2x128xf32>, i32 -> vector<2x128xf32>
    %88 = arith.mulf %84, %68 : vector<2x128xf32>
    %89 = arith.addf %88, %87 : vector<2x128xf32>
    %90 = math.tanh %89 : vector<2x128xf32>
    %91 = arith.mulf %85, %90 : vector<2x128xf32>
    %c4 = arith.constant 4 : index
    %c0_37 = arith.constant 0 : index
    %c0_38 = arith.constant 0 : index
    %92 = vector.load %arg0[%c4, %c0_37, %c0_38] : memref<8x2x128xf32, #tpu.memory_space<vmem>>, vector<1x2x128xf32>
    %93 = vector.shape_cast %92 : vector<1x2x128xf32> to vector<2x128xf32>
    %cst_39 = arith.constant dense<0.000000e+00> : vector<2x128xf32>
    %94 = tpu.matmul %91, %0, %cst_39 {dimension_numbers = #tpu.dot_dimension_numbers<[1], [0], [0], [1], [0, 0, 1, 1], [], []>} : vector<2x128xf32>, vector<128x128xf32>, vector<2x128xf32> -> vector<2x128xf32>
    %95 = arith.addf %93, %94 : vector<2x128xf32>
    %96 = arith.negf %95 : vector<2x128xf32>
    %97 = math.exp %96 : vector<2x128xf32>
    %cst_40 = arith.constant 1.000000e+00 : f32
    %98 = vector.broadcast %cst_40 : f32 to vector<2x128xf32>
    %99 = arith.addf %98, %97 : vector<2x128xf32>
    %100 = arith.divf %98, %99 : vector<2x128xf32>
    %cst_41 = arith.constant 2.000000e+00 : f32
    %101 = vector.broadcast %cst_41 : f32 to vector<2x128xf32>
    %102 = arith.mulf %101, %100 : vector<2x128xf32>
    %cst_42 = arith.constant 1.000000e+00 : f32
    %103 = vector.broadcast %cst_42 : f32 to vector<2x128xf32>
    %104 = arith.subf %102, %103 : vector<2x128xf32>
    %105 = arith.select %5, %104, %100 : vector<2x128xi1>, vector<2x128xf32>
    %c64_i32_43 = arith.constant 64 : i32
    %106 = tpu.dynamic_rotate %105 by %c64_i32_43 dim 1 : vector<2x128xf32>, i32 -> vector<2x128xf32>
    %107 = arith.mulf %105, %106 : vector<2x128xf32>
    %c32_i32_44 = arith.constant 32 : i32
    %108 = tpu.dynamic_rotate %107 by %c32_i32_44 dim 1 : vector<2x128xf32>, i32 -> vector<2x128xf32>
    %109 = arith.mulf %105, %89 : vector<2x128xf32>
    %110 = arith.addf %109, %108 : vector<2x128xf32>
    %111 = math.tanh %110 : vector<2x128xf32>
    %112 = arith.mulf %106, %111 : vector<2x128xf32>
    %c5 = arith.constant 5 : index
    %c0_45 = arith.constant 0 : index
    %c0_46 = arith.constant 0 : index
    %113 = vector.load %arg0[%c5, %c0_45, %c0_46] : memref<8x2x128xf32, #tpu.memory_space<vmem>>, vector<1x2x128xf32>
    %114 = vector.shape_cast %113 : vector<1x2x128xf32> to vector<2x128xf32>
    %cst_47 = arith.constant dense<0.000000e+00> : vector<2x128xf32>
    %115 = tpu.matmul %112, %0, %cst_47 {dimension_numbers = #tpu.dot_dimension_numbers<[1], [0], [0], [1], [0, 0, 1, 1], [], []>} : vector<2x128xf32>, vector<128x128xf32>, vector<2x128xf32> -> vector<2x128xf32>
    %116 = arith.addf %114, %115 : vector<2x128xf32>
    %117 = arith.negf %116 : vector<2x128xf32>
    %118 = math.exp %117 : vector<2x128xf32>
    %cst_48 = arith.constant 1.000000e+00 : f32
    %119 = vector.broadcast %cst_48 : f32 to vector<2x128xf32>
    %120 = arith.addf %119, %118 : vector<2x128xf32>
    %121 = arith.divf %119, %120 : vector<2x128xf32>
    %cst_49 = arith.constant 2.000000e+00 : f32
    %122 = vector.broadcast %cst_49 : f32 to vector<2x128xf32>
    %123 = arith.mulf %122, %121 : vector<2x128xf32>
    %cst_50 = arith.constant 1.000000e+00 : f32
    %124 = vector.broadcast %cst_50 : f32 to vector<2x128xf32>
    %125 = arith.subf %123, %124 : vector<2x128xf32>
    %126 = arith.select %5, %125, %121 : vector<2x128xi1>, vector<2x128xf32>
    %c64_i32_51 = arith.constant 64 : i32
    %127 = tpu.dynamic_rotate %126 by %c64_i32_51 dim 1 : vector<2x128xf32>, i32 -> vector<2x128xf32>
    %128 = arith.mulf %126, %127 : vector<2x128xf32>
    %c32_i32_52 = arith.constant 32 : i32
    %129 = tpu.dynamic_rotate %128 by %c32_i32_52 dim 1 : vector<2x128xf32>, i32 -> vector<2x128xf32>
    %130 = arith.mulf %126, %110 : vector<2x128xf32>
    %131 = arith.addf %130, %129 : vector<2x128xf32>
    %132 = math.tanh %131 : vector<2x128xf32>
    %133 = arith.mulf %127, %132 : vector<2x128xf32>
    %c6 = arith.constant 6 : index
    %c0_53 = arith.constant 0 : index
    %c0_54 = arith.constant 0 : index
    %134 = vector.load %arg0[%c6, %c0_53, %c0_54] : memref<8x2x128xf32, #tpu.memory_space<vmem>>, vector<1x2x128xf32>
    %135 = vector.shape_cast %134 : vector<1x2x128xf32> to vector<2x128xf32>
    %cst_55 = arith.constant dense<0.000000e+00> : vector<2x128xf32>
    %136 = tpu.matmul %133, %0, %cst_55 {dimension_numbers = #tpu.dot_dimension_numbers<[1], [0], [0], [1], [0, 0, 1, 1], [], []>} : vector<2x128xf32>, vector<128x128xf32>, vector<2x128xf32> -> vector<2x128xf32>
    %137 = arith.addf %135, %136 : vector<2x128xf32>
    %138 = arith.negf %137 : vector<2x128xf32>
    %139 = math.exp %138 : vector<2x128xf32>
    %cst_56 = arith.constant 1.000000e+00 : f32
    %140 = vector.broadcast %cst_56 : f32 to vector<2x128xf32>
    %141 = arith.addf %140, %139 : vector<2x128xf32>
    %142 = arith.divf %140, %141 : vector<2x128xf32>
    %cst_57 = arith.constant 2.000000e+00 : f32
    %143 = vector.broadcast %cst_57 : f32 to vector<2x128xf32>
    %144 = arith.mulf %143, %142 : vector<2x128xf32>
    %cst_58 = arith.constant 1.000000e+00 : f32
    %145 = vector.broadcast %cst_58 : f32 to vector<2x128xf32>
    %146 = arith.subf %144, %145 : vector<2x128xf32>
    %147 = arith.select %5, %146, %142 : vector<2x128xi1>, vector<2x128xf32>
    %c64_i32_59 = arith.constant 64 : i32
    %148 = tpu.dynamic_rotate %147 by %c64_i32_59 dim 1 : vector<2x128xf32>, i32 -> vector<2x128xf32>
    %149 = arith.mulf %147, %148 : vector<2x128xf32>
    %c32_i32_60 = arith.constant 32 : i32
    %150 = tpu.dynamic_rotate %149 by %c32_i32_60 dim 1 : vector<2x128xf32>, i32 -> vector<2x128xf32>
    %151 = arith.mulf %147, %131 : vector<2x128xf32>
    %152 = arith.addf %151, %150 : vector<2x128xf32>
    %153 = math.tanh %152 : vector<2x128xf32>
    %154 = arith.mulf %148, %153 : vector<2x128xf32>
    %c7 = arith.constant 7 : index
    %c0_61 = arith.constant 0 : index
    %c0_62 = arith.constant 0 : index
    %155 = vector.load %arg0[%c7, %c0_61, %c0_62] : memref<8x2x128xf32, #tpu.memory_space<vmem>>, vector<1x2x128xf32>
    %156 = vector.shape_cast %155 : vector<1x2x128xf32> to vector<2x128xf32>
    %cst_63 = arith.constant dense<0.000000e+00> : vector<2x128xf32>
    %157 = tpu.matmul %154, %0, %cst_63 {dimension_numbers = #tpu.dot_dimension_numbers<[1], [0], [0], [1], [0, 0, 1, 1], [], []>} : vector<2x128xf32>, vector<128x128xf32>, vector<2x128xf32> -> vector<2x128xf32>
    %158 = arith.addf %156, %157 : vector<2x128xf32>
    %159 = arith.negf %158 : vector<2x128xf32>
    %160 = math.exp %159 : vector<2x128xf32>
    %cst_64 = arith.constant 1.000000e+00 : f32
    %161 = vector.broadcast %cst_64 : f32 to vector<2x128xf32>
    %162 = arith.addf %161, %160 : vector<2x128xf32>
    %163 = arith.divf %161, %162 : vector<2x128xf32>
    %cst_65 = arith.constant 2.000000e+00 : f32
    %164 = vector.broadcast %cst_65 : f32 to vector<2x128xf32>
    %165 = arith.mulf %164, %163 : vector<2x128xf32>
    %cst_66 = arith.constant 1.000000e+00 : f32
    %166 = vector.broadcast %cst_66 : f32 to vector<2x128xf32>
    %167 = arith.subf %165, %166 : vector<2x128xf32>
    %168 = arith.select %5, %167, %163 : vector<2x128xi1>, vector<2x128xf32>
    %c64_i32_67 = arith.constant 64 : i32
    %169 = tpu.dynamic_rotate %168 by %c64_i32_67 dim 1 : vector<2x128xf32>, i32 -> vector<2x128xf32>
    %170 = arith.mulf %168, %169 : vector<2x128xf32>
    %c32_i32_68 = arith.constant 32 : i32
    %171 = tpu.dynamic_rotate %170 by %c32_i32_68 dim 1 : vector<2x128xf32>, i32 -> vector<2x128xf32>
    %172 = arith.mulf %168, %152 : vector<2x128xf32>
    %173 = arith.addf %172, %171 : vector<2x128xf32>
    %174 = math.tanh %173 : vector<2x128xf32>
    %175 = arith.mulf %169, %174 : vector<2x128xf32>
    %176 = vector.broadcast %1 : vector<1x128xf32> to vector<2x128xf32>
    %177 = arith.mulf %175, %176 : vector<2x128xf32>
    %cst_69 = arith.constant dense<0.000000e+00> : vector<2xf32>
    %178 = vector.multi_reduction <add>, %177, %cst_69 [1] : vector<2x128xf32> to vector<2xf32>
    %179 = vector.shape_cast %178 : vector<2xf32> to vector<2x1xf32>
    %180 = vector.broadcast %2 : f32 to vector<2x1xf32>
    %181 = arith.addf %179, %180 : vector<2x1xf32>
    %182 = vector.shape_cast %181 : vector<2x1xf32> to vector<2x1xf32>
    %183 = vector.broadcast %182 : vector<2x1xf32> to vector<2x128xf32>
    %c0_70 = arith.constant 0 : index
    %c0_71 = arith.constant 0 : index
    %184 = vector.load %arg4[%c0_70, %c0_71] : memref<2x128xf32, #tpu.memory_space<vmem>>, vector<2x128xf32>
    tpu.vector_store %arg4[%c0_70, %c0_71], %183 {strides = array<i32>} : memref<2x128xf32, #tpu.memory_space<vmem>>, vector<2x128xf32>,
    return
  }
}

</mosaic_0001>

<bundles_post_ra>
// kernel: tpu_custom_call.1
= control target key start
LH: loop header
LB: loop body
LE: loop exit
PB: predicated region body
PF: predicated region fallthrough
CT: control target
= control target key end

     0   :  { %10 = vsyncpa [#allocation4], 0  ;;  %s930_s0 = inlined_call_operand.hbm [shape: f32[8,2,128], index: 0, kind: input, shape index: {}]   ;;  %s931_s1 = inlined_call_operand.hbm [shape: f32[128,128], index: 1, kind: input, shape index: {}]   ;;  %s932_s2 = inlined_call_operand.vmem [shape: f32[1,128], index: 2, kind: input, shape index: {}]   ;;  %s933_s3 = inlined_call_operand.<no memory space> [shape: f32[1,1], index: 3, kind: input, shape index: {}]   ;;  %s934_s4 = inlined_call_operand.hbm [shape: f32[2,128], index: 4, kind: output, shape index: {}]  }
   0x1   :  { %11 = vsyncpa [#allocation7], 0 }
   0x2   :  { %12 = vsyncpa [#allocation5], 0  ;;  %s17_s17 = sshll.u32 %s930_s0, 4  ;;  %s684_s18 = smov [#allocation3]   ;;  %s18_s17 = int_to_ptr.hbm [resolvable:$true] %s17_s17 }
   0x3   :  { %s19_s19 = sshll.u32 %s684_s18, 4  ;;  %s30_s22 = sshll.u32 %s931_s1, 4  ;;  %s20_s19 = int_to_ptr.vmem [resolvable:$true] %s19_s19  ;;  %s31_s22 = int_to_ptr.hbm [resolvable:$true] %s30_s22 }
   0x4   :  { %s685_s23 = smov 32   ;;  %s686_s24 = smov 2  }
   0x5   :  { %25 = dma.hbm_to_vmem [thread:$0]  %s18_s17, 256, %s20_s19, [#allocation4], %s685_s23, %s685_s23, %s686_s24  }
   0x6   :  { %s687_s25 = smov [#allocation6]   ;;  %s688_s27 = smov 128  }
   0x7   :  { %s32_s26 = sshll.u32 %s687_s25, 4  ;;  %s689_s28 = smov 8   ;;  %s33_s26 = int_to_ptr.vmem [resolvable:$true] %s32_s26 }
   0x8   :  { %38 = dma.hbm_to_vmem [thread:$0]  %s31_s22, 2048, %s33_s26, [#allocation7], %s688_s27, %s688_s27, %s689_s28  }
   0x9   :  { %678 = dma.done.wait [#allocation4], 256  }
   0xa   :  { %679 = vsyncadd [#allocation4], 4294967040 }
   0xb   :  { %680 = dma.done.wait [#allocation7], 2048  }
   0xc   :  { %681 = vsyncadd [#allocation7], 4294965248  ;;  %v726_v0 = vld [vmem:[#allocation6 + $0x78] sm:$0xff]  ;;  %v728_v1 = vld [vmem:[#allocation6 + $0x70] sm:$0xff]  ;;  %v690_v16 = vmov 0.0   ;;  %v69_v26 = vlaneseq  ;;  %s691_s0 = smov 64  }
   0xd   :  { %73 = vmatpush.msra.mxu0 %v726_v0  ;;  %127 = vmatpush.msra.mxu1 %v726_v0  ;;  %v732_v2 = vld [vmem:[#allocation6 + $0x68] sm:$0xff]  ;;  %v738_v3 = vld [vmem:[#allocation6 + $0x60] sm:$0xff]  ;;  %v744_v4 = vld [vmem:[#allocation6 + $0x58] sm:$0xff]  ;;  %s692_s6 = smov [#allocation8]   ;;  %s521_s10 = sshll.u32 %s934_s4, 4  ;;  %s522_s10 = int_to_ptr.hbm [resolvable:$true] %s521_s10 }
   0xe   :  { %181 = vmatpush.msra.mxu2 %v726_v0  ;;  %235 = vmatpush.msra.mxu3 %v726_v0  ;;  %v750_v5 = vld [vmem:[#allocation6 + $0x50] sm:$0xff]  ;;  %v756_v6 = vld [vmem:[#allocation6 + $0x48] sm:$0xff]  ;;  %v762_v7 = vld [vmem:[#allocation6 + $0x40] sm:$0xff]  ;;  %v886_v31 = vand.u32 127, %v69_v26  ;;  %s519_s7 = sshll.u32 %s692_s6, 4  ;;  %s520_s7 = int_to_ptr.vmem [resolvable:$true] %s519_s7 }
   0xf   :  { %74 = vmatpush.msra.mxu0 %v728_v1  ;;  %128 = vmatpush.msra.mxu1 %v728_v1  ;;  %v768_v8 = vld [vmem:[#allocation6 + $0x38] sm:$0xff]  ;;  %v774_v9 = vld [vmem:[#allocation6 + $0x30] sm:$0xff]  ;;  %v780_v10 = vld [vmem:[#allocation6 + $0x28] sm:$0xff] }
  0x10   :  { %182 = vmatpush.msra.mxu2 %v728_v1  ;;  %236 = vmatpush.msra.mxu3 %v728_v1  ;;  %v786_v11 = vld [vmem:[#allocation6 + $0x20] sm:$0xff]  ;;  %v792_v12 = vld [vmem:[#allocation6 + $0x18] sm:$0xff]  ;;  %v798_v13 = vld [vmem:[#allocation6 + $0x10] sm:$0xff]  ;;  %vm71_vm4 = vcmp.ge.s32.totalorder %v886_v31, 96 }
  0x11   :  { %75 = vmatpush.msra.mxu0 %v732_v2  ;;  %129 = vmatpush.msra.mxu1 %v732_v2  ;;  %v804_v14 = vld [vmem:[#allocation6 + $0x8] sm:$0xff]  ;;  %v810_v15 = vld [vmem:[#allocation6] sm:$0xff]  ;;  %v72_v17 = vld [vmem:[#allocation3] sm:$0x3] }
  0x12   :  { %183 = vmatpush.msra.mxu2 %v732_v2  ;;  %237 = vmatpush.msra.mxu3 %v732_v2  ;;  %v126_v45 = vld [vmem:[#allocation3 + $0x2] sm:$0x3] }
  0x13   :  { %76 = vmatpush.msra.mxu0 %v738_v3  ;;  %130 = vmatpush.msra.mxu1 %v738_v3 }
  0x14   :  { %184 = vmatpush.msra.mxu2 %v738_v3  ;;  %238 = vmatpush.msra.mxu3 %v738_v3 }
  0x15   :  { %77 = vmatpush.msra.mxu0 %v744_v4  ;;  %131 = vmatpush.msra.mxu1 %v744_v4 }
  0x16   :  { %185 = vmatpush.msra.mxu2 %v744_v4  ;;  %239 = vmatpush.msra.mxu3 %v744_v4 }
  0x17   :  { %78 = vmatpush.msra.mxu0 %v750_v5  ;;  %132 = vmatpush.msra.mxu1 %v750_v5 }
  0x18   :  { %186 = vmatpush.msra.mxu2 %v750_v5  ;;  %240 = vmatpush.msra.mxu3 %v750_v5 }
  0x19   :  { %79 = vmatpush.msra.mxu0 %v756_v6  ;;  %133 = vmatpush.msra.mxu1 %v756_v6 }
  0x1a   :  { %187 = vmatpush.msra.mxu2 %v756_v6  ;;  %241 = vmatpush.msra.mxu3 %v756_v6 }
  0x1b   :  { %80 = vmatpush.msra.mxu0 %v762_v7  ;;  %134 = vmatpush.msra.mxu1 %v762_v7 }
  0x1c   :  { %188 = vmatpush.msra.mxu2 %v762_v7  ;;  %242 = vmatpush.msra.mxu3 %v762_v7 }
  0x1d   :  { %81 = vmatpush.msra.mxu0 %v768_v8  ;;  %135 = vmatpush.msra.mxu1 %v768_v8 }
  0x1e   :  { %189 = vmatpush.msra.mxu2 %v768_v8  ;;  %243 = vmatpush.msra.mxu3 %v768_v8 }
  0x1f   :  { %82 = vmatpush.msra.mxu0 %v774_v9  ;;  %136 = vmatpush.msra.mxu1 %v774_v9 }
  0x20   :  { %190 = vmatpush.msra.mxu2 %v774_v9  ;;  %244 = vmatpush.msra.mxu3 %v774_v9 }
  0x21   :  { %83 = vmatpush.msra.mxu0 %v780_v10  ;;  %137 = vmatpush.msra.mxu1 %v780_v10 }
  0x22   :  { %191 = vmatpush.msra.mxu2 %v780_v10  ;;  %245 = vmatpush.msra.mxu3 %v780_v10 }
  0x23   :  { %84 = vmatpush.msra.mxu0 %v786_v11  ;;  %138 = vmatpush.msra.mxu1 %v786_v11 }
  0x24   :  { %192 = vmatpush.msra.mxu2 %v786_v11  ;;  %246 = vmatpush.msra.mxu3 %v786_v11 }
  0x25   :  { %85 = vmatpush.msra.mxu0 %v792_v12  ;;  %139 = vmatpush.msra.mxu1 %v792_v12 }
  0x26   :  { %193 = vmatpush.msra.mxu2 %v792_v12  ;;  %247 = vmatpush.msra.mxu3 %v792_v12 }
  0x27   :  { %86 = vmatpush.msra.mxu0 %v798_v13  ;;  %140 = vmatpush.msra.mxu1 %v798_v13 }
  0x28   :  { %194 = vmatpush.msra.mxu2 %v798_v13  ;;  %248 = vmatpush.msra.mxu3 %v798_v13 }
  0x29   :  { %87 = vmatpush.msra.mxu0 %v804_v14  ;;  %141 = vmatpush.msra.mxu1 %v804_v14 }
  0x2a   :  { %195 = vmatpush.msra.mxu2 %v804_v14  ;;  %249 = vmatpush.msra.mxu3 %v804_v14 }
  0x2b   :  { %88 = vmatpush.msra.mxu0 %v810_v15  ;;  %142 = vmatpush.msra.mxu1 %v810_v15 }
  0x2c   :  { %89 = vmatmul.f32.vlgmr.msra.gmra.mxu0 %v690_v16  ;;  %196 = vmatpush.msra.mxu2 %v810_v15 }
  0x2d   :  { %250 = vmatpush.msra.mxu3 %v810_v15  ;;  %289 = vmatpush.msrb.mxu0 %v726_v0 }
  0x2e   :  { %343 = vmatpush.msrb.mxu1 %v726_v0  ;;  %397 = vmatpush.msrb.mxu2 %v726_v0 }
  0x2f   :  { %290 = vmatpush.msrb.mxu0 %v728_v1  ;;  %451 = vmatpush.msrb.mxu3 %v726_v0 }
  0x30   :  { %344 = vmatpush.msrb.mxu1 %v728_v1  ;;  %398 = vmatpush.msrb.mxu2 %v728_v1 }
  0x31   :  { %291 = vmatpush.msrb.mxu0 %v732_v2  ;;  %452 = vmatpush.msrb.mxu3 %v728_v1 }
  0x32   :  { %345 = vmatpush.msrb.mxu1 %v732_v2  ;;  %399 = vmatpush.msrb.mxu2 %v732_v2 }
  0x33   :  { %292 = vmatpush.msrb.mxu0 %v738_v3  ;;  %453 = vmatpush.msrb.mxu3 %v732_v2 }
  0x34   :  { %346 = vmatpush.msrb.mxu1 %v738_v3  ;;  %400 = vmatpush.msrb.mxu2 %v738_v3 }
  0x35   :  { %293 = vmatpush.msrb.mxu0 %v744_v4  ;;  %454 = vmatpush.msrb.mxu3 %v738_v3 }
  0x36   :  { %347 = vmatpush.msrb.mxu1 %v744_v4  ;;  %401 = vmatpush.msrb.mxu2 %v744_v4 }
  0x37   :  { %294 = vmatpush.msrb.mxu0 %v750_v5  ;;  %455 = vmatpush.msrb.mxu3 %v744_v4 }
  0x38   :  { %348 = vmatpush.msrb.mxu1 %v750_v5  ;;  %402 = vmatpush.msrb.mxu2 %v750_v5 }
  0x39   :  { %295 = vmatpush.msrb.mxu0 %v756_v6  ;;  %456 = vmatpush.msrb.mxu3 %v750_v5 }
  0x3a   :  { %349 = vmatpush.msrb.mxu1 %v756_v6  ;;  %403 = vmatpush.msrb.mxu2 %v756_v6 }
  0x3b   :  { %296 = vmatpush.msrb.mxu0 %v762_v7  ;;  %457 = vmatpush.msrb.mxu3 %v756_v6 }
  0x3c   :  { %350 = vmatpush.msrb.mxu1 %v762_v7  ;;  %404 = vmatpush.msrb.mxu2 %v762_v7 }
  0x3d   :  { %297 = vmatpush.msrb.mxu0 %v768_v8  ;;  %458 = vmatpush.msrb.mxu3 %v762_v7  ;;  %v180_v7 = vld [vmem:[#allocation3 + $0x4] sm:$0x3] }
  0x3e   :  { %351 = vmatpush.msrb.mxu1 %v768_v8  ;;  %405 = vmatpush.msrb.mxu2 %v768_v8 }
  0x3f   :  { %298 = vmatpush.msrb.mxu0 %v774_v9  ;;  %459 = vmatpush.msrb.mxu3 %v768_v8 }
  0x40   :  { %352 = vmatpush.msrb.mxu1 %v774_v9  ;;  %406 = vmatpush.msrb.mxu2 %v774_v9 }
  0x41   :  { %299 = vmatpush.msrb.mxu0 %v780_v10  ;;  %460 = vmatpush.msrb.mxu3 %v774_v9 }
  0x42   :  { %353 = vmatpush.msrb.mxu1 %v780_v10  ;;  %407 = vmatpush.msrb.mxu2 %v780_v10 }
  0x43   :  { %300 = vmatpush.msrb.mxu0 %v786_v11  ;;  %461 = vmatpush.msrb.mxu3 %v780_v10 }
  0x44   :  { %354 = vmatpush.msrb.mxu1 %v786_v11  ;;  %408 = vmatpush.msrb.mxu2 %v786_v11 }
  0x45   :  { %301 = vmatpush.msrb.mxu0 %v792_v12  ;;  %462 = vmatpush.msrb.mxu3 %v786_v11 }
  0x46   :  { %355 = vmatpush.msrb.mxu1 %v792_v12  ;;  %409 = vmatpush.msrb.mxu2 %v792_v12 }
  0x47   :  { %302 = vmatpush.msrb.mxu0 %v798_v13  ;;  %463 = vmatpush.msrb.mxu3 %v792_v12 }
  0x48   :  { %356 = vmatpush.msrb.mxu1 %v798_v13  ;;  %410 = vmatpush.msrb.mxu2 %v798_v13 }
  0x49   :  { %303 = vmatpush.msrb.mxu0 %v804_v14  ;;  %464 = vmatpush.msrb.mxu3 %v798_v13 }
  0x4a   :  { %357 = vmatpush.msrb.mxu1 %v804_v14  ;;  %411 = vmatpush.msrb.mxu2 %v804_v14 }
  0x4b   :  { %304 = vmatpush.msrb.mxu0 %v810_v15  ;;  %465 = vmatpush.msrb.mxu3 %v804_v14 }
  0x4c   :  { %358 = vmatpush.msrb.mxu1 %v810_v15  ;;  %412 = vmatpush.msrb.mxu2 %v810_v15 }
  0x4d   :  { %466 = vmatpush.msrb.mxu3 %v810_v15 }
  0xa9   :  { %v90_v18 = vpop.f32.mrf.mxu0 }
  0xaa   :  { %v93_v19 = vadd.f32 %v90_v18, %v72_v17 }
  0xac   :  { %v532_v20 = vmul.f32 -1.442695, %v93_v19 }
  0xae   :  { %558 = vpow2.f32 %v532_v20 }
  0xb4   :  { %v559_v21 = vpop.eup %558 }
  0xb5   :  { %v97_v22 = vadd.f32 1.0, %v559_v21 }
  0xb7   :  { %560 = vrcp.f32 %v97_v22  ;;  %v109_v27 = vand.u32 2147483648, %v97_v22  ;;  %v107_v29 = vand.u32 2147483647, %v97_v22  ;;  %vm103_vm1 = vweird.f32 %v97_v22 }
  0xb9   :  { %v110_v32 = vor.u32 1.1754944e-38, %v109_v27  ;;  %vm108_vm3 = vcmp.eq.f32.partialorder %v107_v29, 8.507059e+37 }
  0xbd   :  { %v561_v23 = vpop.eup %560 }
  0xbe   :  { %v99_v24 = vmul.f32 %v561_v23, %v97_v22  ;;  %vm104_vm0 = vweird.f32 %v561_v23 }
  0xbf   :  { %vm105_vm2 = vmor %vm103_vm1, %vm104_vm0 }
  0xc0   :  { %v100_v25 = vsub.f32 1.0, %v99_v24 }
  0xc2   :  { %v101_v28 = vmul.f32 %v561_v23, %v100_v25 }
  0xc4   :  { %v102_v30 = vadd.f32 %v561_v23, %v101_v28 }
  0xc6   :  { %v106_v33 = vsel %vm105_vm2, %v561_v23, %v102_v30 }
  0xc7   :  { %v111_v34 = vsel %vm108_vm3, %v110_v32, %v106_v33 }
  0xc8   :  { %v113_v35 = vmul.f32 2.0, %v111_v34 }
  0xca   :  { %v533_v36 = vadd.f32 -1.0, %v113_v35 }
  0xcc   :  { %v115_v37 = vsel %vm71_vm4, %v533_v36, %v111_v34  ;;  %v234_v34 = vld [vmem:[#allocation3 + $0x6] sm:$0x3] }
  0xcd   :  { %116 = vrot.lane.b32.xlu0 %v115_v37, %s691_s0  ;;  %v121_v40 = vmul.f32 0.0, %v115_v37 }
 0x13f   :  { %v117_v38 = vpop.permute.xlu0 %116 }
 0x140   :  { %v118_v39 = vmul.f32 %v117_v38, %v115_v37 }
 0x142   :  { %119 = vrot.lane.b32.xlu0 %v118_v39, %s685_s23 }
 0x1b4   :  { %v120_v41 = vpop.permute.xlu0 %119 }
 0x1b5   :  { %v122_v42 = vadd.f32 %v121_v40, %v120_v41 }
 0x1b7   :  { %562 = vtanh.f32 %v122_v42 }
 0x1bd   :  { %v563_v43 = vpop.eup %562 }
 0x1be   :  { %v124_v44 = vmul.f32 %v563_v43, %v117_v38 }
 0x1c0   :  { %143 = vmatmul.f32.vlgmr.msra.gmra.mxu1 %v124_v44 }
 0x23d   :  { %v144_v46 = vpop.f32.mrf.mxu1 }
 0x23e   :  { %v147_v47 = vadd.f32 %v144_v46, %v126_v45 }
 0x240   :  { %v534_v48 = vmul.f32 -1.442695, %v147_v47 }
 0x242   :  { %564 = vpow2.f32 %v534_v48 }
 0x248   :  { %v565_v49 = vpop.eup %564 }
 0x249   :  { %v151_v50 = vadd.f32 1.0, %v565_v49 }
 0x24b   :  { %566 = vrcp.f32 %v151_v50  ;;  %v163_v54 = vand.u32 2147483648, %v151_v50  ;;  %v161_v56 = vand.u32 2147483647, %v151_v50  ;;  %vm157_vm6 = vweird.f32 %v151_v50 }
 0x24d   :  { %v164_v58 = vor.u32 1.1754944e-38, %v163_v54  ;;  %vm162_vm8 = vcmp.eq.f32.partialorder %v161_v56, 8.507059e+37 }
 0x251   :  { %v567_v51 = vpop.eup %566 }
 0x252   :  { %v153_v52 = vmul.f32 %v567_v51, %v151_v50  ;;  %vm158_vm5 = vweird.f32 %v567_v51 }
 0x253   :  { %vm159_vm7 = vmor %vm157_vm6, %vm158_vm5 }
 0x254   :  { %v154_v53 = vsub.f32 1.0, %v153_v52 }
 0x256   :  { %v155_v55 = vmul.f32 %v567_v51, %v154_v53 }
 0x258   :  { %v156_v57 = vadd.f32 %v567_v51, %v155_v55 }
 0x25a   :  { %v160_v59 = vsel %vm159_vm7, %v567_v51, %v156_v57 }
 0x25b   :  { %v165_v60 = vsel %vm162_vm8, %v164_v58, %v160_v59 }
 0x25c   :  { %v167_v61 = vmul.f32 2.0, %v165_v60 }
 0x25e   :  { %v535_v62 = vadd.f32 -1.0, %v167_v61 }
 0x260   :  { %v169_v63 = vsel %vm71_vm4, %v535_v62, %v165_v60  ;;  %v288_v60 = vld [vmem:[#allocation3 + $0x8] sm:$0x3] }
 0x261   :  { %170 = vrot.lane.b32.xlu1 %v169_v63, %s691_s0  ;;  %v175_v2 = vmul.f32 %v169_v63, %v122_v42 }
 0x2d3   :  { %v171_v0 = vpop.permute.xlu1 %170 }
 0x2d4   :  { %v172_v1 = vmul.f32 %v171_v0, %v169_v63 }
 0x2d6   :  { %173 = vrot.lane.b32.xlu1 %v172_v1, %s685_s23 }
 0x348   :  { %v174_v3 = vpop.permute.xlu1 %173 }
 0x349   :  { %v176_v4 = vadd.f32 %v175_v2, %v174_v3 }
 0x34b   :  { %568 = vtanh.f32 %v176_v4 }
 0x351   :  { %v569_v5 = vpop.eup %568 }
 0x352   :  { %v178_v6 = vmul.f32 %v569_v5, %v171_v0 }
 0x354   :  { %197 = vmatmul.f32.vlgmr.msra.gmra.mxu2 %v178_v6 }
 0x3d7   :  { %v198_v8 = vpop.f32.mrf.mxu2 }
 0x3d8   :  { %v201_v9 = vadd.f32 %v198_v8, %v180_v7 }
 0x3da   :  { %v536_v10 = vmul.f32 -1.442695, %v201_v9 }
 0x3dc   :  { %570 = vpow2.f32 %v536_v10 }
 0x3e2   :  { %v571_v11 = vpop.eup %570 }
 0x3e3   :  { %v205_v12 = vadd.f32 1.0, %v571_v11 }
 0x3e5   :  { %572 = vrcp.f32 %v205_v12  ;;  %v217_v16 = vand.u32 2147483648, %v205_v12  ;;  %v215_v18 = vand.u32 2147483647, %v205_v12  ;;  %vm211_vm10 = vweird.f32 %v205_v12 }
 0x3e7   :  { %v218_v20 = vor.u32 1.1754944e-38, %v217_v16  ;;  %vm216_vm12 = vcmp.eq.f32.partialorder %v215_v18, 8.507059e+37 }
 0x3eb   :  { %v573_v13 = vpop.eup %572 }
 0x3ec   :  { %v207_v14 = vmul.f32 %v573_v13, %v205_v12  ;;  %vm212_vm9 = vweird.f32 %v573_v13 }
 0x3ed   :  { %vm213_vm11 = vmor %vm211_vm10, %vm212_vm9 }
 0x3ee   :  { %v208_v15 = vsub.f32 1.0, %v207_v14 }
 0x3f0   :  { %v209_v17 = vmul.f32 %v573_v13, %v208_v15 }
 0x3f2   :  { %v210_v19 = vadd.f32 %v573_v13, %v209_v17 }
 0x3f4   :  { %v214_v21 = vsel %vm213_vm11, %v573_v13, %v210_v19 }
 0x3f5   :  { %v219_v22 = vsel %vm216_vm12, %v218_v20, %v214_v21 }
 0x3f6   :  { %v221_v23 = vmul.f32 2.0, %v219_v22 }
 0x3f8   :  { %v537_v24 = vadd.f32 -1.0, %v221_v23 }
 0x3fa   :  { %v223_v25 = vsel %vm71_vm4, %v537_v24, %v219_v22  ;;  %v342_v22 = vld [vmem:[#allocation3 + $0xa] sm:$0x3] }
 0x3fb   :  { %224 = vrot.lane.b32.xlu2 %v223_v25, %s691_s0  ;;  %v229_v28 = vmul.f32 %v223_v25, %v176_v4 }
 0x455   :  { %v225_v26 = vpop.permute.xlu2 %224 }
 0x456   :  { %v226_v27 = vmul.f32 %v225_v26, %v223_v25 }
 0x458   :  { %227 = vrot.lane.b32.xlu2 %v226_v27, %s685_s23 }
 0x4b2   :  { %v228_v29 = vpop.permute.xlu2 %227 }
 0x4b3   :  { %v230_v30 = vadd.f32 %v229_v28, %v228_v29 }
 0x4b5   :  { %574 = vtanh.f32 %v230_v30 }
 0x4bb   :  { %v575_v32 = vpop.eup %574 }
 0x4bc   :  { %v232_v33 = vmul.f32 %v575_v32, %v225_v26 }
 0x4be   :  { %251 = vmatmul.f32.vlgmr.msra.gmra.mxu3 %v232_v33 }
 0x541   :  { %v252_v35 = vpop.f32.mrf.mxu3 }
 0x542   :  { %v255_v36 = vadd.f32 %v252_v35, %v234_v34 }
 0x544   :  { %v538_v37 = vmul.f32 -1.442695, %v255_v36 }
 0x546   :  { %576 = vpow2.f32 %v538_v37 }
 0x54c   :  { %v577_v38 = vpop.eup %576 }
 0x54d   :  { %v259_v39 = vadd.f32 1.0, %v577_v38 }
 0x54f   :  { %578 = vrcp.f32 %v259_v39  ;;  %v271_v43 = vand.u32 2147483648, %v259_v39  ;;  %v269_v45 = vand.u32 2147483647, %v259_v39  ;;  %vm265_vm14 = vweird.f32 %v259_v39 }
 0x551   :  { %v272_v47 = vor.u32 1.1754944e-38, %v271_v43  ;;  %vm270_vm0 = vcmp.eq.f32.partialorder %v269_v45, 8.507059e+37 }
 0x555   :  { %v579_v40 = vpop.eup %578 }
 0x556   :  { %v261_v41 = vmul.f32 %v579_v40, %v259_v39  ;;  %vm266_vm13 = vweird.f32 %v579_v40 }
 0x557   :  { %vm267_vm15 = vmor %vm265_vm14, %vm266_vm13 }
 0x558   :  { %v262_v42 = vsub.f32 1.0, %v261_v41 }
 0x55a   :  { %v263_v44 = vmul.f32 %v579_v40, %v262_v42 }
 0x55c   :  { %v264_v46 = vadd.f32 %v579_v40, %v263_v44 }
 0x55e   :  { %v268_v48 = vsel %vm267_vm15, %v579_v40, %v264_v46 }
 0x55f   :  { %v273_v49 = vsel %vm270_vm0, %v272_v47, %v268_v48 }
 0x560   :  { %v275_v50 = vmul.f32 2.0, %v273_v49 }
 0x562   :  { %v539_v51 = vadd.f32 -1.0, %v275_v50 }
 0x564   :  { %v277_v52 = vsel %vm71_vm4, %v539_v51, %v273_v49  ;;  %v396_v49 = vld [vmem:[#allocation3 + $0xc] sm:$0x3] }
 0x565   :  { %278 = vrot.lane.b32.xlu0 %v277_v52, %s691_s0  ;;  %v283_v55 = vmul.f32 %v277_v52, %v230_v30 }
 0x5d7   :  { %v279_v53 = vpop.permute.xlu0 %278 }
 0x5d8   :  { %v280_v54 = vmul.f32 %v279_v53, %v277_v52 }
 0x5da   :  { %281 = vrot.lane.b32.xlu1 %v280_v54, %s685_s23 }
 0x64c   :  { %v282_v56 = vpop.permute.xlu1 %281 }
 0x64d   :  { %v284_v57 = vadd.f32 %v283_v55, %v282_v56 }
 0x64f   :  { %580 = vtanh.f32 %v284_v57 }
 0x655   :  { %v581_v58 = vpop.eup %580 }
 0x656   :  { %v286_v59 = vmul.f32 %v581_v58, %v279_v53 }
 0x658   :  { %305 = vmatmul.f32.vlgmr.msrb.gmra.mxu0 %v286_v59 }
 0x6d5   :  { %v306_v61 = vpop.f32.mrf.mxu0 }
 0x6d6   :  { %v309_v62 = vadd.f32 %v306_v61, %v288_v60 }
 0x6d8   :  { %v540_v63 = vmul.f32 -1.442695, %v309_v62 }
 0x6da   :  { %582 = vpow2.f32 %v540_v63 }
 0x6e0   :  { %v583_v0 = vpop.eup %582 }
 0x6e1   :  { %v313_v1 = vadd.f32 1.0, %v583_v0 }
 0x6e3   :  { %584 = vrcp.f32 %v313_v1  ;;  %v325_v5 = vand.u32 2147483648, %v313_v1  ;;  %v323_v7 = vand.u32 2147483647, %v313_v1  ;;  %vm319_vm2 = vweird.f32 %v313_v1 }
 0x6e5   :  { %v326_v9 = vor.u32 1.1754944e-38, %v325_v5  ;;  %vm324_vm5 = vcmp.eq.f32.partialorder %v323_v7, 8.507059e+37 }
 0x6e9   :  { %v585_v2 = vpop.eup %584 }
 0x6ea   :  { %v315_v3 = vmul.f32 %v585_v2, %v313_v1  ;;  %vm320_vm1 = vweird.f32 %v585_v2 }
 0x6eb   :  { %vm321_vm3 = vmor %vm319_vm2, %vm320_vm1  ;;  %vm507_vm2 = vcmask 1041408  }
 0x6ec   :  { %v316_v4 = vsub.f32 1.0, %v315_v3 }
 0x6ee   :  { %v317_v6 = vmul.f32 %v585_v2, %v316_v4 }
 0x6f0   :  { %v318_v8 = vadd.f32 %v585_v2, %v317_v6 }
 0x6f2   :  { %v322_v10 = vsel %vm321_vm3, %v585_v2, %v318_v8 }
 0x6f3   :  { %v327_v11 = vsel %vm324_vm5, %v326_v9, %v322_v10 }
 0x6f4   :  { %v329_v12 = vmul.f32 2.0, %v327_v11 }
 0x6f6   :  { %v541_v13 = vadd.f32 -1.0, %v329_v12 }
 0x6f8   :  { %v331_v14 = vsel %vm71_vm4, %v541_v13, %v327_v11  ;;  %v450_v11 = vld [vmem:[#allocation3 + $0xe] sm:$0x3] }
 0x6f9   :  { %332 = vrot.lane.b32.xlu2 %v331_v14, %s691_s0  ;;  %v337_v17 = vmul.f32 %v331_v14, %v284_v57 }
 0x753   :  { %v333_v15 = vpop.permute.xlu2 %332 }
 0x754   :  { %v334_v16 = vmul.f32 %v333_v15, %v331_v14 }
 0x756   :  { %335 = vrot.lane.b32.xlu0 %v334_v16, %s685_s23 }
 0x7c8   :  { %v336_v18 = vpop.permute.xlu0 %335 }
 0x7c9   :  { %v338_v19 = vadd.f32 %v337_v17, %v336_v18 }
 0x7cb   :  { %586 = vtanh.f32 %v338_v19 }
 0x7d1   :  { %v587_v20 = vpop.eup %586 }
 0x7d2   :  { %v340_v21 = vmul.f32 %v587_v20, %v333_v15 }
 0x7d4   :  { %359 = vmatmul.f32.vlgmr.msrb.gmra.mxu1 %v340_v21 }
 0x851   :  { %v360_v23 = vpop.f32.mrf.mxu1 }
 0x852   :  { %v363_v24 = vadd.f32 %v360_v23, %v342_v22 }
 0x854   :  { %v542_v25 = vmul.f32 -1.442695, %v363_v24 }
 0x856   :  { %588 = vpow2.f32 %v542_v25 }
 0x85c   :  { %v589_v26 = vpop.eup %588 }
 0x85d   :  { %v367_v27 = vadd.f32 1.0, %v589_v26 }
 0x85f   :  { %590 = vrcp.f32 %v367_v27  ;;  %v379_v32 = vand.u32 2147483648, %v367_v27  ;;  %v377_v34 = vand.u32 2147483647, %v367_v27  ;;  %vm373_vm7 = vweird.f32 %v367_v27 }
 0x861   :  { %v380_v36 = vor.u32 1.1754944e-38, %v379_v32  ;;  %vm378_vm9 = vcmp.eq.f32.partialorder %v377_v34, 8.507059e+37 }
 0x865   :  { %v591_v28 = vpop.eup %590 }
 0x866   :  { %v369_v29 = vmul.f32 %v591_v28, %v367_v27  ;;  %vm374_vm6 = vweird.f32 %v591_v28 }
 0x867   :  { %vm375_vm8 = vmor %vm373_vm7, %vm374_vm6 }
 0x868   :  { %v370_v30 = vsub.f32 1.0, %v369_v29 }
 0x86a   :  { %v371_v33 = vmul.f32 %v591_v28, %v370_v30 }
 0x86c   :  { %v372_v35 = vadd.f32 %v591_v28, %v371_v33 }
 0x86e   :  { %v376_v37 = vsel %vm375_vm8, %v591_v28, %v372_v35 }
 0x86f   :  { %v381_v38 = vsel %vm378_vm9, %v380_v36, %v376_v37  ;;  %v557_v36 = vld [vmem:[%s932_s2] ss:$0 sm:$0xff] }
 0x870   :  { %v383_v39 = vmul.f32 2.0, %v381_v38 }
 0x872   :  { %v543_v40 = vadd.f32 -1.0, %v383_v39 }
 0x874   :  { %v385_v41 = vsel %vm71_vm4, %v543_v40, %v381_v38  ;;  %v511_v40 = vstv %s933_s3 }
 0x875   :  { %386 = vrot.lane.b32.xlu1 %v385_v41, %s691_s0  ;;  %v391_v44 = vmul.f32 %v385_v41, %v338_v19 }
 0x8e7   :  { %v387_v42 = vpop.permute.xlu1 %386 }
 0x8e8   :  { %v388_v43 = vmul.f32 %v387_v42, %v385_v41 }
 0x8ea   :  { %389 = vrot.lane.b32.xlu2 %v388_v43, %s685_s23 }
 0x944   :  { %v390_v45 = vpop.permute.xlu2 %389 }
 0x945   :  { %v392_v46 = vadd.f32 %v391_v44, %v390_v45 }
 0x947   :  { %592 = vtanh.f32 %v392_v46 }
 0x94d   :  { %v593_v47 = vpop.eup %592 }
 0x94e   :  { %v394_v48 = vmul.f32 %v593_v47, %v387_v42 }
 0x950   :  { %413 = vmatmul.f32.vlgmr.msrb.gmra.mxu2 %v394_v48 }
 0x9d3   :  { %v414_v50 = vpop.f32.mrf.mxu2 }
 0x9d4   :  { %v417_v51 = vadd.f32 %v414_v50, %v396_v49 }
 0x9d6   :  { %v544_v52 = vmul.f32 -1.442695, %v417_v51 }
 0x9d8   :  { %594 = vpow2.f32 %v544_v52 }
 0x9de   :  { %v595_v53 = vpop.eup %594 }
 0x9df   :  { %v421_v54 = vadd.f32 1.0, %v595_v53 }
 0x9e1   :  { %596 = vrcp.f32 %v421_v54  ;;  %v433_v58 = vand.u32 2147483648, %v421_v54  ;;  %v431_v60 = vand.u32 2147483647, %v421_v54  ;;  %vm427_vm11 = vweird.f32 %v421_v54 }
 0x9e3   :  { %v434_v62 = vor.u32 1.1754944e-38, %v433_v58  ;;  %vm432_vm13 = vcmp.eq.f32.partialorder %v431_v60, 8.507059e+37 }
 0x9e7   :  { %v597_v55 = vpop.eup %596 }
 0x9e8   :  { %v423_v56 = vmul.f32 %v597_v55, %v421_v54  ;;  %vm428_vm10 = vweird.f32 %v597_v55 }
 0x9e9   :  { %vm429_vm12 = vmor %vm427_vm11, %vm428_vm10 }
 0x9ea   :  { %v424_v57 = vsub.f32 1.0, %v423_v56 }
 0x9ec   :  { %v425_v59 = vmul.f32 %v597_v55, %v424_v57 }
 0x9ee   :  { %v426_v61 = vadd.f32 %v597_v55, %v425_v59 }
 0x9f0   :  { %v430_v63 = vsel %vm429_vm12, %v597_v55, %v426_v61 }
 0x9f1   :  { %v435_v0 = vsel %vm432_vm13, %v434_v62, %v430_v63 }
 0x9f2   :  { %v437_v1 = vmul.f32 2.0, %v435_v0 }
 0x9f4   :  { %v545_v2 = vadd.f32 -1.0, %v437_v1 }
 0x9f6   :  { %v439_v3 = vsel %vm71_vm4, %v545_v2, %v435_v0 }
 0x9f7   :  { %440 = vrot.lane.b32.xlu0 %v439_v3, %s691_s0  ;;  %v445_v6 = vmul.f32 %v439_v3, %v392_v46 }
 0xa69   :  { %v441_v4 = vpop.permute.xlu0 %440 }
 0xa6a   :  { %v442_v5 = vmul.f32 %v441_v4, %v439_v3 }
 0xa6c   :  { %443 = vrot.lane.b32.xlu1 %v442_v5, %s685_s23 }
 0xade   :  { %v444_v7 = vpop.permute.xlu1 %443 }
 0xadf   :  { %v446_v8 = vadd.f32 %v445_v6, %v444_v7 }
 0xae1   :  { %598 = vtanh.f32 %v446_v8 }
 0xae7   :  { %v599_v9 = vpop.eup %598 }
 0xae8   :  { %v448_v10 = vmul.f32 %v599_v9, %v441_v4 }
 0xaea   :  { %467 = vmatmul.f32.vlgmr.msrb.gmra.mxu3 %v448_v10 }
 0xb6d   :  { %v468_v12 = vpop.f32.mrf.mxu3 }
 0xb6e   :  { %v471_v13 = vadd.f32 %v468_v12, %v450_v11 }
 0xb70   :  { %v546_v14 = vmul.f32 -1.442695, %v471_v13 }
 0xb72   :  { %600 = vpow2.f32 %v546_v14 }
 0xb78   :  { %v601_v15 = vpop.eup %600 }
 0xb79   :  { %v475_v16 = vadd.f32 1.0, %v601_v15 }
 0xb7b   :  { %602 = vrcp.f32 %v475_v16  ;;  %v487_v20 = vand.u32 2147483648, %v475_v16  ;;  %v485_v22 = vand.u32 2147483647, %v475_v16  ;;  %vm481_vm15 = vweird.f32 %v475_v16 }
 0xb7d   :  { %v488_v24 = vor.u32 1.1754944e-38, %v487_v20  ;;  %vm486_vm1 = vcmp.eq.f32.partialorder %v485_v22, 8.507059e+37 }
 0xb81   :  { %v603_v17 = vpop.eup %602 }
 0xb82   :  { %v477_v18 = vmul.f32 %v603_v17, %v475_v16  ;;  %vm482_vm14 = vweird.f32 %v603_v17 }
 0xb83   :  { %vm483_vm0 = vmor %vm481_vm15, %vm482_vm14 }
 0xb84   :  { %v478_v19 = vsub.f32 1.0, %v477_v18 }
 0xb86   :  { %v479_v21 = vmul.f32 %v603_v17, %v478_v19 }
 0xb88   :  { %v480_v23 = vadd.f32 %v603_v17, %v479_v21 }
 0xb8a   :  { %v484_v25 = vsel %vm483_vm0, %v603_v17, %v480_v23 }
 0xb8b   :  { %v489_v26 = vsel %vm486_vm1, %v488_v24, %v484_v25 }
 0xb8c   :  { %v491_v27 = vmul.f32 2.0, %v489_v26 }
 0xb8e   :  { %v547_v28 = vadd.f32 -1.0, %v491_v27 }
 0xb90   :  { %v493_v29 = vsel %vm71_vm4, %v547_v28, %v489_v26 }
 0xb91   :  { %494 = vrot.lane.b32.xlu2 %v493_v29, %s691_s0  ;;  %v499_v33 = vmul.f32 %v493_v29, %v446_v8 }
 0xbeb   :  { %v495_v30 = vpop.permute.xlu2 %494 }
 0xbec   :  { %v496_v32 = vmul.f32 %v495_v30, %v493_v29 }
 0xbee   :  { %497 = vrot.lane.b32.xlu0 %v496_v32, %s685_s23 }
 0xc60   :  { %v498_v34 = vpop.permute.xlu0 %497 }
 0xc61   :  { %v500_v35 = vadd.f32 %v499_v33, %v498_v34 }
 0xc63   :  { %604 = vtanh.f32 %v500_v35 }
 0xc69   :  { %v605_v37 = vpop.eup %604 }
 0xc6a   :  { %v502_v38 = vmul.f32 %v605_v37, %v495_v30 }
 0xc6c   :  { %v506_v39 = vmul.f32 %v557_v36, %v502_v38 }
 0xc6e   :  { %v508_v31 = vsel %vm507_vm2, %v506_v39, 0.0 }
 0xc6f   :  { %509 = vadd.xlane.f32.xlu1 %v508_v31 }
 0xce2   :  { %v510_v41 = vpop.xlane.xlu1 %509 }
 0xce3   :  { %v512_v42 = vadd.f32 %v511_v40, %v510_v41 }
 0xce5   :  { %513 = vst [vmem:[#allocation8] sm:$0x3] %v512_v42 }
 0xce6   :  { %524 = dma.vmem_to_hbm [thread:$0]  %s520_s7, 32, %s522_s10, [#allocation5]  }
 0xce7   :  { %682 = dma.done.wait [#allocation5], 32  }
 0xce8   :  { %683 = vsyncadd [#allocation5], 4294967264 }
 0xce9   :  { %529 = vsyncpa [#allocation4], 1 }
 0xcea   :  { %530 = vsyncpa [#allocation7], 1 }
 0xceb   :  { %531 = vsyncpa [#allocation5], 1 }

</bundles_post_ra>
